<compile_context>
chip_gen: v7x
topology: tpu7x:2x2x1
jax: 0.10.0
libtpu: 0.0.40
codegen_flags: <defaults>
</compile_context>

<pallas_src>
import jax
import jax.numpy as jnp
from jax.experimental import pallas as pl
from jax.experimental.pallas import tpu as pltpu

_LANES = 128
_SUBLANES = 8


def _round_up(x: int, m: int) -> int:
    return ((x + m - 1) // m) * m


def _cdiv(a: int, b: int) -> int:
    return (a + b - 1) // b


def _make_kernel(eps: float, block_rows: int):
    n_groups = block_rows // _SUBLANES

    def kernel(x_ref, o_ref, acc_ref):
        s = pl.program_id(1)

        @pl.when(s == 0)
        def _init():
            acc_ref[...] = jnp.zeros_like(acc_ref)

        p = x_ref[...].astype(jnp.float32)              # (TB, 128), f32 accum
        contrib = p * jnp.log(p + jnp.float32(eps))     # VPU mul + EUP log
        # Pure-VPU partial reduction: add groups of 8 sublanes (vreg adds,
        # no cross-lane XLU work per step).
        acc_ref[...] += contrib.reshape(n_groups, _SUBLANES, _LANES).sum(axis=0)

        @pl.when(s == pl.num_programs(1) - 1)
        def _finalize():
            # Lane-dense (1, 8, 128) partial-sum write (unmasked vst).
            o_ref[...] = acc_ref[...].reshape(1, _SUBLANES, _LANES)

    return kernel


def entropy_penalty(logits: jax.Array, weight: float = 0.1, eps: float = 1e-8,
                    block_rows: int = 2048) -> jax.Array:
    """Pallas TPU implementation of EntropyPenalty.forward. Returns f32 scalar.

    Accepts f32 or bf16 input (accumulation is always f32 in-kernel, which
    halves HBM traffic for bf16 producers).
    """
    B, C = logits.shape
    total = B * C

    # ---- lane-dense layout + tile sizing ------------------------------------
    rows = _cdiv(total, _LANES)
    # block_rows=2048 -> 1 MiB f32 input block: ~2-3 MiB of VMEM with double
    # buffering + scratch, far below scoped-VMEM defaults (16 MiB v5e,
    # 32 MiB v6e/v7x) and v7x's 64 MiB physical VMEM per TensorCore.
    tb = min(block_rows, _round_up(rows, _SUBLANES))
    tb = _round_up(tb, _SUBLANES)
    num_blocks = _cdiv(rows, tb)

    # Leading "parallel" axis: two chunks when there is enough work so v7x's
    # two TensorCores can each take half; costs nothing on 1-TC chips.
    n_par = 2 if num_blocks >= 2 else 1
    steps = _cdiv(num_blocks, n_par)
    rows_padded = n_par * steps * tb

    flat = jnp.ravel(logits)
    pad = rows_padded * _LANES - total
    if pad:
        # Zero padding contributes exactly 0 * log(eps) == 0 to the sum.
        flat = jnp.concatenate([flat, jnp.zeros((pad,), dtype=flat.dtype)])
    x = flat.reshape(rows_padded, _LANES)

    # NOTE: for tiny inputs (a few thousand elements) a plain fused XLA
    # expression is faster than any pallas_call; the Pallas path is kept
    # unconditionally here so the kernel itself is exercised.
    partials = pl.pallas_call(
        _make_kernel(eps, tb),
        out_shape=jax.ShapeDtypeStruct((n_par, _SUBLANES, _LANES), jnp.float32),
        grid_spec=pltpu.PrefetchScalarGridSpec(
            num_scalar_prefetch=0,
            grid=(n_par, steps),
            in_specs=[pl.BlockSpec((tb, _LANES),
                                   lambda p, s: (p * steps + s, 0))],
            out_specs=pl.BlockSpec((1, _SUBLANES, _LANES),
                                   lambda p, s: (p, 0, 0)),
            scratch_shapes=[pltpu.VMEM((_SUBLANES, _LANES), jnp.float32)],
        ),
        compiler_params=pltpu.CompilerParams(
            dimension_semantics=("parallel", "arbitrary")),
        cost_estimate=pl.CostEstimate(
            flops=3 * total,
            transcendentals=total,
            bytes_accessed=rows_padded * _LANES * x.dtype.itemsize
            + n_par * _SUBLANES * _LANES * 4),
    )(x)

    # mean(-sum(p*logp, dim=1)) == -(1/B) * sum_all(p*logp)
    return (-weight / B) * jnp.sum(partials)


def entropy_penalty_ref(logits, weight=0.1, eps=1e-8):
    """Pure-JAX reference (mirrors the PyTorch code)."""
    p = logits.astype(jnp.float32)
    ent = -jnp.sum(p * jnp.log(p + eps), axis=1)
    return weight * jnp.mean(ent)


if __name__ == "__main__":
    key = jax.random.PRNGKey(0)
    weight = 0.1
    k1, k2 = jax.random.split(key)

    # Small shape matching the module's (batch_size x num_classes) convention.
    # The module logs the raw input, so build probability-like inputs.
    batch, num_classes = 8, 32
    raw = jax.random.uniform(k1, (batch, num_classes), dtype=jnp.float32)
    logits = raw / jnp.sum(raw, axis=1, keepdims=True)

    out = jax.block_until_ready(entropy_penalty(logits, weight=weight))
    ref = entropy_penalty_ref(logits, weight=weight)
    assert jnp.allclose(out, ref, rtol=1e-5, atol=1e-6), (out, ref)

    # Second (still small) case that exercises the multi-block grid, the
    # parallel chunk axis, the accumulator init/finalize, and zero padding.
    batch2, classes2 = 16, 130
    raw2 = jax.random.uniform(k2, (batch2, classes2), dtype=jnp.float32)
    logits2 = raw2 / jnp.sum(raw2, axis=1, keepdims=True)
    out2 = jax.block_until_ready(
        entropy_penalty(logits2, weight=weight, block_rows=8))
    ref2 = entropy_penalty_ref(logits2, weight=weight)
    assert jnp.allclose(out2, ref2, rtol=1e-5, atol=1e-6), (out2, ref2)

    print("KERNEL_OK")
</pallas_src>

<mosaic_0001>
module attributes {stable_mosaic.version = 11 : i64} {
  func.func @kernel(%arg0: i32, %arg1: i32, %arg2: memref<8x128xf32, #tpu.memory_space<vmem>>, %arg3: memref<1x8x128xf32, #tpu.memory_space<vmem>>, %arg4: memref<8x128xf32, #tpu.memory_space<vmem>>) attributes {dimension_semantics = [#tpu.dimension_semantics<parallel>, #tpu.dimension_semantics<arbitrary>], iteration_bounds = array<i64: 1, 1>, scalar_prefetch = 0 : i64, scratch_operands = 1 : i64, tpu.core_type = #tpu.core_type<tc>, window_params = [{transform_indices = @transform_0, window_bounds = array<i64: 8, 128>}, {transform_indices = @transform_1, window_bounds = array<i64: 1, 8, 128>}]} {
    %c0_i32 = arith.constant 0 : i32
    %0 = arith.cmpi eq, %arg1, %c0_i32 : i32
    %1 = arith.extui %0 : i1 to i32
    %c0_i32_0 = arith.constant 0 : i32
    %2 = arith.cmpi ne, %1, %c0_i32_0 : i32
    scf.if %2 {
      %cst_9 = arith.constant 0.000000e+00 : f32
      %16 = vector.broadcast %cst_9 : f32 to vector<8x128xf32>
      %c0_10 = arith.constant 0 : index
      %c0_11 = arith.constant 0 : index
      %17 = vector.load %arg4[%c0_10, %c0_11] : memref<8x128xf32, #tpu.memory_space<vmem>>, vector<8x128xf32>
      tpu.vector_store %arg4[%c0_10, %c0_11], %16 {strides = array<i32>} : memref<8x128xf32, #tpu.memory_space<vmem>>, vector<8x128xf32>,
    } else {
    }
    %c0 = arith.constant 0 : index
    %c0_1 = arith.constant 0 : index
    %3 = vector.load %arg2[%c0, %c0_1] : memref<8x128xf32, #tpu.memory_space<vmem>>, vector<8x128xf32>
    %cst = arith.constant 9.99999993E-9 : f32
    %4 = vector.broadcast %cst : f32 to vector<8x128xf32>
    %5 = arith.addf %3, %4 : vector<8x128xf32>
    %6 = math.log %5 : vector<8x128xf32>
    %7 = arith.mulf %3, %6 : vector<8x128xf32>
    %c0_2 = arith.constant 0 : index
    %c0_3 = arith.constant 0 : index
    %8 = vector.load %arg4[%c0_2, %c0_3] : memref<8x128xf32, #tpu.memory_space<vmem>>, vector<8x128xf32>
    %9 = vector.shape_cast %7 : vector<8x128xf32> to vector<1x8x128xf32>
    %cst_4 = arith.constant dense<0.000000e+00> : vector<8x128xf32>
    %10 = vector.multi_reduction <add>, %9, %cst_4 [0] : vector<1x8x128xf32> to vector<8x128xf32>
    %11 = arith.addf %8, %10 : vector<8x128xf32>
    %c0_5 = arith.constant 0 : index
    %c0_6 = arith.constant 0 : index
    %12 = vector.load %arg4[%c0_5, %c0_6] : memref<8x128xf32, #tpu.memory_space<vmem>>, vector<8x128xf32>
    tpu.vector_store %arg4[%c0_5, %c0_6], %11 {strides = array<i32>} : memref<8x128xf32, #tpu.memory_space<vmem>>, vector<8x128xf32>,
    %c0_i32_7 = arith.constant 0 : i32
    %13 = arith.cmpi eq, %arg1, %c0_i32_7 : i32
    %14 = arith.extui %13 : i1 to i32
    %c0_i32_8 = arith.constant 0 : i32
    %15 = arith.cmpi ne, %14, %c0_i32_8 : i32
    scf.if %15 {
      %c0_9 = arith.constant 0 : index
      %c0_10 = arith.constant 0 : index
      %16 = vector.load %arg4[%c0_9, %c0_10] : memref<8x128xf32, #tpu.memory_space<vmem>>, vector<8x128xf32>
      %17 = vector.shape_cast %16 : vector<8x128xf32> to vector<1x8x128xf32>
      %c0_11 = arith.constant 0 : index
      %c0_12 = arith.constant 0 : index
      %c0_13 = arith.constant 0 : index
      %18 = vector.load %arg3[%c0_11, %c0_12, %c0_13] : memref<1x8x128xf32, #tpu.memory_space<vmem>>, vector<1x8x128xf32>
      tpu.vector_store %arg3[%c0_11, %c0_12, %c0_13], %17 {strides = array<i32>} : memref<1x8x128xf32, #tpu.memory_space<vmem>>, vector<1x8x128xf32>,
    } else {
    }
    return
  }
  func.func @transform_0(%arg0: i32, %arg1: i32) -> (i32, i32) {
    %c1_i32 = arith.constant 1 : i32
    %0 = arith.muli %arg0, %c1_i32 : i32
    %1 = arith.addi %0, %arg1 : i32
    %c0_i32 = arith.constant 0 : i32
    %c0_i32_0 = arith.constant 0 : i32
    return %1, %c0_i32 : i32, i32
  }
  func.func @transform_1(%arg0: i32, %arg1: i32) -> (i32, i32, i32) {
    %c0_i32 = arith.constant 0 : i32
    %c0_i32_0 = arith.constant 0 : i32
    %c0_i32_1 = arith.constant 0 : i32
    return %arg0, %c0_i32, %c0_i32_0 : i32, i32, i32
  }
}

</mosaic_0001>

<bundles_post_ra>
// kernel: tpu_custom_call.1
= control target key start
LH: loop header
LB: loop body
LE: loop exit
PB: predicated region body
PF: predicated region fallthrough
CT: control target
= control target key end

     0   :  { %6 = vsyncpa [#allocation4], 0  ;;  %s147_s0 = inlined_call_operand.hbm [shape: f32[8,128], index: 0, kind: input, shape index: {}]   ;;  %s148_s1 = inlined_call_operand.hbm [shape: f32[1,8,128], index: 1, kind: output, shape index: {}]  }
   0x1   :  { %7 = vsyncpa [#allocation5], 0  ;;  %s111_s6 = smov [#allocation3]   ;;  %s63_s10 = scalar_lea.hbm %s147_s0, 128 }
   0x2   :  { %s17_s7 = sshll.u32 %s111_s6, 4  ;;  %p64_p0 = scmp.ne.s32.totalorder %s147_s0, %s63_s10  ;;  %s18_s7 = int_to_ptr.vmem [resolvable:$true] %s17_s7 }
   0x3   :  { %p67_p1 = scmp.lt.u32.totalorder %s63_s10, %s147_s0 }
   0x5   :  { %p69_p2 = pnand %p67_p1, %p64_p0 }
   0x7   :  { %72 = shalt.err (!%p69_p2)
}
   0x8   :  { %s73_s15 = scalar_lea.vmem %s18_s7, 128  ;;  %p78_p4 = scmp.lt.s32.totalorder %s18_s7, %s18_s7 }
   0x9   :  { %p74_p3 = scmp.ne.s32.totalorder %s18_s7, %s73_s15  ;;  %p79_p5 = scmp.lt.s32.totalorder %s73_s15, %s73_s15 }
   0xb   :  { %p80_p6 = por %p79_p5, %p78_p4 }
   0xd   :  { %p81_p7 = pnand %p80_p6, %p74_p3 }
   0xf   :  { %84 = shalt.err (!%p81_p7)
}
  0x10   :  { %20 = dma.hbm_to_vmem [thread:$0]  %s147_s0, 128, %s18_s7, [#allocation4]  }
  0x11   :  { %107 = dma.done.wait [#allocation4], 128  }
  0x12   :  { %108 = vsyncadd [#allocation4], 4294967168  ;;  %v30_v0 = vld [vmem:[#allocation3] sm:$0xff]  ;;  %s112_s18 = smov [#allocation6]  }
  0x13   :  { %v31_v1 = vadd.f32 1e-08, %v30_v0  ;;  %s50_s19 = sshll.u32 %s112_s18, 4  ;;  %s51_s19 = int_to_ptr.vmem [resolvable:$true] %s50_s19 }
  0x14   :  { %s85_s20 = scalar_lea.vmem %s51_s19, 128  ;;  %p90_p9 = scmp.lt.s32.totalorder %s51_s19, %s51_s19 }
  0x15   :  { %61 = vlog2.f32 %v31_v1  ;;  %p86_p8 = scmp.ne.s32.totalorder %s51_s19, %s85_s20  ;;  %p91_p10 = scmp.lt.s32.totalorder %s85_s20, %s85_s20 }
  0x17   :  { %p92_p11 = por %p91_p10, %p90_p9 }
  0x19   :  { %p93_p12 = pnand %p92_p11, %p86_p8 }
  0x1f   :  { %v62_v2 = vpop.eup %61 }
  0x20   :  { %v33_v3 = vmul.f32 0.6931472, %v62_v2 }
  0x22   :  { %v34_v4 = vmul.f32 %v33_v3, %v30_v0 }
  0x24   :  { %43 = vst [vmem:[#allocation6] sm:$0xff] %v34_v4 }
  0x25   :  { %96 = shalt.err (!%p93_p12)
}
  0x26   :  { %s97_s22 = scalar_lea.hbm %s148_s1, 128 }
  0x27   :  { %p98_p13 = scmp.ne.s32.totalorder %s148_s1, %s97_s22  ;;  %p101_p0 = scmp.lt.u32.totalorder %s97_s22, %s148_s1 }
  0x29   :  { %p103_p1 = pnand %p101_p0, %p98_p13 }
  0x2b   :  { %106 = shalt.err (!%p103_p1)
}
  0x2c   :  { %53 = dma.vmem_to_hbm [thread:$0]  %s51_s19, 128, %s148_s1, [#allocation5]  }
  0x2d   :  { %109 = dma.done.wait [#allocation5], 128  }
  0x2e   :  { %110 = vsyncadd [#allocation5], 4294967168 }
  0x2f   :  { %57 = vsyncpa [#allocation4], 1 }
  0x30   :  { %58 = vsyncpa [#allocation5], 1 }

</bundles_post_ra>
